<compile_context>
chip_gen: v7x
topology: tpu7x:2x2x1
jax: 0.10.0
libtpu: 0.0.40
codegen_flags: <defaults>
</compile_context>

<pallas_src>
import jax
import jax.numpy as jnp
from jax.experimental import pallas as pl
from jax.experimental.pallas import tpu as pltpu


def mlp_kernel(x_ref, w1_ref, b1_ref, w2_ref, b2_ref, o_ref, acc_ref):
    k = pl.program_id(1)

    @pl.when(k == 0)
    def _():
        acc_ref[...] = jnp.zeros_like(acc_ref)

    # Layer 1 partial product on the MXU; f32 accumulation in VMEM scratch.
    acc_ref[...] += jnp.dot(x_ref[...], w1_ref[...],
                            preferred_element_type=jnp.float32)

    @pl.when(k == pl.num_programs(1) - 1)
    def _():
        h = jnp.maximum(acc_ref[...] + b1_ref[...], 0.0)        # bias + ReLU, [TB, H]
        # Layer 2 has out_features == 1: VPU multiply + XLU lane reduction
        # instead of an N=1 MXU matmul.
        y = jnp.sum(h * w2_ref[...], axis=-1, keepdims=True)    # [TB, 1]
        # Transpose FIRST, then bias + sigmoid on the lane-dense [1, TB] strip.
        yt = y.T                                                 # [1, TB]
        o_ref[...] = jax.nn.sigmoid(yt + b2_ref[0, 0]).astype(o_ref.dtype)


def _round_down(v, m):
    return (v // m) * m


def _spec(shape, index_map, buffers=None):
    if buffers is None:
        return pl.BlockSpec(shape, index_map)
    return pl.BlockSpec(shape, index_map, pipeline_mode=pl.Buffered(buffers))


def neural_net_forward(x, w1, b1, w2, b2, *,
                       tile_vmem_bytes=4 * 1024 * 1024,
                       resident_w1_bytes=8 * 1024 * 1024,
                       x_buffers=2):
    """x: [B, D]; w1: [D, H]; b1: [1, H]; w2: [1, H]; b2: [1, 1] -> [B, 1] f32.

    For lowest HBM traffic pass x (and w1) already in bf16 upstream; casting
    here in the wrapper would add a full extra HBM pass over x.
    Raise `x_buffers` to 3 if xprof shows exposed DMA on tiny-D shapes.
    """
    B, D = x.shape
    H = w1.shape[1]
    x_item = x.dtype.itemsize
    w1_item = w1.dtype.itemsize

    # ---- K (= D) tiling: stream w1 in K blocks when it can't sit resident ----
    if D * H * w1_item <= resident_w1_bytes or D % 128 != 0:
        # TODO(synk): if D % 128 != 0 AND w1 exceeds the resident budget, pad
        # D/H to 128 (256 on v6e/v7x) multiples once at init time, not per call.
        tk = D
    else:
        tk_target = max(128, _round_down(resident_w1_bytes // max(H * w1_item, 1), 128))
        tk = 128
        for cand in range(min(tk_target, D), 127, -128):
            if D % cand == 0:
                tk = cand
                break
    nk = D // tk
    # TODO(synk): add an H (output-column) tiling axis for hidden dims where the
    # [tb, H] accumulator / [tk, H] weight block no longer fit VMEM.

    # ---- Batch tile: VMEM-budget-driven, 128-aligned, >=2 steps when B > 256 ----
    if B <= 256:
        tb = B                      # one block; (8,128) rule satisfied via full-dim match
    else:
        tb_x = tile_vmem_bytes // max(tk * x_item, 1)        # x-tile budget
        tb_acc = (2 * tile_vmem_bytes) // max(H * 4, 1)      # f32 accumulator budget
        tb = _round_down(min(tb_x, tb_acc), 128)
        tb = max(128, min(tb, 8192))
        # Guarantee >= 2 grid steps so the "parallel" batch axis can be split
        # across v7x's two TensorCores (no-op on single-TC v5e/v6e).
        tb = min(tb, max(128, _round_down((B + 1) // 2, 128)))
    nb = pl.cdiv(B, tb)   # ragged tail: garbage rows' outputs land past column B
                          # and are discarded; wrapper slices out[:, :B].

    # ---- Explicit VMEM budget (generation-aware cap, with headroom) ----
    try:
        vmem_cap = int(pltpu.get_tpu_info().vmem_capacity_bytes)
    except Exception:
        vmem_cap = 64 * 1024 * 1024              # v7x per-TC size: safe lower bound
    w1_bufs = 1 if nk == 1 else 2                # resident (Buffered(1)) vs. streamed
    needed = (x_buffers * tb * tk * x_item       # streamed x tiles
              + w1_bufs * tk * H * w1_item       # w1 tile(s)
              + tb * H * 4                       # f32 accumulator scratch
              + 2 * H * 4                        # b1, w2 (single-buffered)
              + 2 * tb * 4)                      # (1, tb) output strip
    vmem_limit = int(min(0.9 * vmem_cap,
                         max(32 * 1024 * 1024, 1.25 * needed + (2 << 20))))

    cost = pl.CostEstimate(
        flops=2 * B * D * H + 5 * B * H + 4 * B,
        transcendentals=B,
        bytes_accessed=(B * D * x_item
                        + (1 if nk == 1 else nb) * D * H * w1_item
                        + (b1.size + w2.size + b2.size) * 4
                        + B * 4),
    )

    out = pl.pallas_call(
        mlp_kernel,
        out_shape=jax.ShapeDtypeStruct((1, B), jnp.float32),
        grid=(nb, nk),
        in_specs=[
            # Streamed (batch, K) tiles of x.
            _spec((tb, tk), lambda i, k: (i, k), buffers=x_buffers),
            # w1: single-buffered resident when nk == 1, double-buffered stream otherwise.
            _spec((tk, H), lambda i, k: (k, 0), buffers=1 if nk == 1 else None),
            # b1 / w2: constant block index -> fetched once, single buffer.
            _spec((1, H), lambda i, k: (0, 0), buffers=1),
            _spec((1, H), lambda i, k: (0, 0), buffers=1),
            # Scalar second bias in SMEM.
            pl.BlockSpec(memory_space=pltpu.MemorySpace.SMEM),
        ],
        # Lane-dense output: one (1, tb) strip per batch tile, resident across k.
        out_specs=pl.BlockSpec((1, tb), lambda i, k: (0, i)),
        scratch_shapes=[pltpu.VMEM((tb, H), jnp.float32)],
        compiler_params=pltpu.CompilerParams(
            dimension_semantics=("parallel", "arbitrary"),
            vmem_limit_bytes=vmem_limit,
        ),
        cost_estimate=cost,
    )(x, w1, b1, w2, b2)

    return out[0, :B].reshape(B, 1)


def init_params(key, input_dim, hidden_dim):
    # Deterministic init mimicking nn.Linear's U(-1/sqrt(fan_in), 1/sqrt(fan_in)).
    k1, k2, k3, k4 = jax.random.split(key, 4)
    bound1 = 1.0 / jnp.sqrt(input_dim)
    bound2 = 1.0 / jnp.sqrt(hidden_dim)
    # w1 pre-transposed to [in, out]; w2 kept in nn.Linear's [out=1, in=H] layout.
    w1 = jax.random.uniform(k1, (input_dim, hidden_dim), jnp.float32, -bound1, bound1)
    b1 = jax.random.uniform(k2, (1, hidden_dim), jnp.float32, -bound1, bound1)
    w2 = jax.random.uniform(k3, (1, hidden_dim), jnp.float32, -bound2, bound2)
    b2 = jax.random.uniform(k4, (1, 1), jnp.float32, -bound2, bound2)
    return w1, b1, w2, b2


if __name__ == "__main__":
    key = jax.random.PRNGKey(0)
    kx, kp = jax.random.split(key)

    batch, input_dim, hidden_dim = 8, 16, 32
    x = jax.random.normal(kx, (batch, input_dim), jnp.float32)
    w1, b1, w2, b2 = init_params(kp, input_dim, hidden_dim)

    out = neural_net_forward(x, w1, b1, w2, b2)
    out = jax.block_until_ready(out)

    # Reference check in plain JAX (same math as the PyTorch module).
    ref = jax.nn.sigmoid(jnp.maximum(x @ w1 + b1, 0.0) @ w2.T + b2)
    assert out.shape == (batch, 1)
    assert jnp.allclose(out, ref, atol=1e-5, rtol=1e-5)

    print("KERNEL_OK")
</pallas_src>

<mosaic_0001>
module attributes {stable_mosaic.version = 11 : i64} {
  func.func @mlp_kernel(%arg0: i32, %arg1: i32, %arg2: memref<8x16xf32, #tpu.memory_space<vmem>>, %arg3: memref<16x32xf32, #tpu.memory_space<vmem>>, %arg4: memref<1x32xf32, #tpu.memory_space<vmem>>, %arg5: memref<1x32xf32, #tpu.memory_space<vmem>>, %arg6: memref<1x1xf32, #tpu.memory_space<smem>>, %arg7: memref<1x8xf32, #tpu.memory_space<vmem>>, %arg8: memref<8x32xf32, #tpu.memory_space<vmem>>) attributes {dimension_semantics = [#tpu.dimension_semantics<parallel>, #tpu.dimension_semantics<arbitrary>], iteration_bounds = array<i64: 1, 1>, scalar_prefetch = 0 : i64, scratch_operands = 1 : i64, tpu.core_type = #tpu.core_type<tc>, window_params = [{pipeline_mode = #tpu.pipeline_mode<double_buffered>, transform_indices = @transform_0, window_bounds = array<i64: 8, 16>}, {pipeline_mode = #tpu.pipeline_mode<synchronous>, transform_indices = @transform_1, window_bounds = array<i64: 16, 32>}, {pipeline_mode = #tpu.pipeline_mode<synchronous>, transform_indices = @transform_2, window_bounds = array<i64: 1, 32>}, {pipeline_mode = #tpu.pipeline_mode<synchronous>, transform_indices = @transform_3, window_bounds = array<i64: 1, 32>}, {transform_indices = @transform_4, window_bounds = array<i64: 1, 1>}, {transform_indices = @transform_5, window_bounds = array<i64: 1, 8>}]} {
    %c0_i32 = arith.constant 0 : i32
    %0 = arith.cmpi eq, %arg1, %c0_i32 : i32
    %1 = arith.extui %0 : i1 to i32
    %c0_i32_0 = arith.constant 0 : i32
    %2 = arith.cmpi ne, %1, %c0_i32_0 : i32
    scf.if %2 {
      %cst_10 = arith.constant 0.000000e+00 : f32
      %12 = vector.broadcast %cst_10 : f32 to vector<8x32xf32>
      %c0_11 = arith.constant 0 : index
      %c0_12 = arith.constant 0 : index
      %13 = vector.load %arg8[%c0_11, %c0_12] : memref<8x32xf32, #tpu.memory_space<vmem>>, vector<8x32xf32>
      tpu.vector_store %arg8[%c0_11, %c0_12], %12 {strides = array<i32>} : memref<8x32xf32, #tpu.memory_space<vmem>>, vector<8x32xf32>,
    } else {
    }
    %c0 = arith.constant 0 : index
    %c0_1 = arith.constant 0 : index
    %3 = vector.load %arg8[%c0, %c0_1] : memref<8x32xf32, #tpu.memory_space<vmem>>, vector<8x32xf32>
    %c0_2 = arith.constant 0 : index
    %c0_3 = arith.constant 0 : index
    %4 = vector.load %arg2[%c0_2, %c0_3] : memref<8x16xf32, #tpu.memory_space<vmem>>, vector<8x16xf32>
    %c0_4 = arith.constant 0 : index
    %c0_5 = arith.constant 0 : index
    %5 = vector.load %arg3[%c0_4, %c0_5] : memref<16x32xf32, #tpu.memory_space<vmem>>, vector<16x32xf32>
    %cst = arith.constant dense<0.000000e+00> : vector<8x32xf32>
    %6 = tpu.matmul %4, %5, %cst {dimension_numbers = #tpu.dot_dimension_numbers<[1], [0], [0], [1], [0, 0, 1, 1], [], []>} : vector<8x16xf32>, vector<16x32xf32>, vector<8x32xf32> -> vector<8x32xf32>
    %7 = arith.addf %3, %6 : vector<8x32xf32>
    %c0_6 = arith.constant 0 : index
    %c0_7 = arith.constant 0 : index
    %8 = vector.load %arg8[%c0_6, %c0_7] : memref<8x32xf32, #tpu.memory_space<vmem>>, vector<8x32xf32>
    tpu.vector_store %arg8[%c0_6, %c0_7], %7 {strides = array<i32>} : memref<8x32xf32, #tpu.memory_space<vmem>>, vector<8x32xf32>,
    %c0_i32_8 = arith.constant 0 : i32
    %9 = arith.cmpi eq, %arg1, %c0_i32_8 : i32
    %10 = arith.extui %9 : i1 to i32
    %c0_i32_9 = arith.constant 0 : i32
    %11 = arith.cmpi ne, %10, %c0_i32_9 : i32
    scf.if %11 {
      %c0_10 = arith.constant 0 : index
      %c0_11 = arith.constant 0 : index
      %12 = vector.load %arg8[%c0_10, %c0_11] : memref<8x32xf32, #tpu.memory_space<vmem>>, vector<8x32xf32>
      %c0_12 = arith.constant 0 : index
      %c0_13 = arith.constant 0 : index
      %13 = vector.load %arg4[%c0_12, %c0_13] : memref<1x32xf32, #tpu.memory_space<vmem>>, vector<1x32xf32>
      %14 = vector.broadcast %13 : vector<1x32xf32> to vector<8x32xf32>
      %15 = arith.addf %12, %14 : vector<8x32xf32>
      %cst_14 = arith.constant 0.000000e+00 : f32
      %16 = vector.broadcast %cst_14 : f32 to vector<8x32xf32>
      %17 = arith.maximumf %15, %16 : vector<8x32xf32>
      %c0_15 = arith.constant 0 : index
      %c0_16 = arith.constant 0 : index
      %18 = vector.load %arg5[%c0_15, %c0_16] : memref<1x32xf32, #tpu.memory_space<vmem>>, vector<1x32xf32>
      %19 = vector.broadcast %18 : vector<1x32xf32> to vector<8x32xf32>
      %20 = arith.mulf %17, %19 : vector<8x32xf32>
      %cst_17 = arith.constant dense<0.000000e+00> : vector<8xf32>
      %21 = vector.multi_reduction <add>, %20, %cst_17 [1] : vector<8x32xf32> to vector<8xf32>
      %22 = vector.shape_cast %21 : vector<8xf32> to vector<8x1xf32>
      %23 = tpu.transpose %22, [1, 0] : vector<8x1xf32> -> vector<1x8xf32>
      %c0_18 = arith.constant 0 : index
      %c0_19 = arith.constant 0 : index
      %24 = memref.load %arg6[%c0_18, %c0_19] : memref<1x1xf32, #tpu.memory_space<smem>>
      %25 = vector.broadcast %24 : f32 to vector<1x8xf32>
      %26 = arith.addf %23, %25 : vector<1x8xf32>
      %27 = arith.negf %26 : vector<1x8xf32>
      %28 = math.exp %27 : vector<1x8xf32>
      %cst_20 = arith.constant 1.000000e+00 : f32
      %29 = vector.broadcast %cst_20 : f32 to vector<1x8xf32>
      %30 = arith.addf %29, %28 : vector<1x8xf32>
      %31 = arith.divf %29, %30 : vector<1x8xf32>
      %c0_21 = arith.constant 0 : index
      %c0_22 = arith.constant 0 : index
      %32 = vector.load %arg7[%c0_21, %c0_22] : memref<1x8xf32, #tpu.memory_space<vmem>>, vector<1x8xf32>
      tpu.vector_store %arg7[%c0_21, %c0_22], %31 {strides = array<i32>} : memref<1x8xf32, #tpu.memory_space<vmem>>, vector<1x8xf32>,
    } else {
    }
    return
  }
  func.func @transform_0(%arg0: i32, %arg1: i32) -> (i32, i32) {
    %c0_i32 = arith.constant 0 : i32
    return %arg0, %arg1 : i32, i32
  }
  func.func @transform_1(%arg0: i32, %arg1: i32) -> (i32, i32) {
    %c0_i32 = arith.constant 0 : i32
    %c0_i32_0 = arith.constant 0 : i32
    return %arg1, %c0_i32 : i32, i32
  }
  func.func @transform_2(%arg0: i32, %arg1: i32) -> (i32, i32) {
    %c0_i32 = arith.constant 0 : i32
    %c0_i32_0 = arith.constant 0 : i32
    %c0_i32_1 = arith.constant 0 : i32
    return %c0_i32, %c0_i32_0 : i32, i32
  }
  func.func @transform_3(%arg0: i32, %arg1: i32) -> (i32, i32) {
    %c0_i32 = arith.constant 0 : i32
    %c0_i32_0 = arith.constant 0 : i32
    %c0_i32_1 = arith.constant 0 : i32
    return %c0_i32, %c0_i32_0 : i32, i32
  }
  func.func @transform_4(%arg0: i32, %arg1: i32) -> (i32, i32) {
    %c0_i32 = arith.constant 0 : i32
    %c0_i32_0 = arith.constant 0 : i32
    %c0_i32_1 = arith.constant 0 : i32
    return %c0_i32, %c0_i32_0 : i32, i32
  }
  func.func @transform_5(%arg0: i32, %arg1: i32) -> (i32, i32) {
    %c0_i32 = arith.constant 0 : i32
    %c0_i32_0 = arith.constant 0 : i32
    return %c0_i32, %arg0 : i32, i32
  }
}

</mosaic_0001>

<bundles_post_ra>
// kernel: tpu_custom_call.1
= control target key start
LH: loop header
LB: loop body
LE: loop exit
PB: predicated region body
PF: predicated region fallthrough
CT: control target
= control target key end

     0   :  { %11 = vsyncpa [#allocation5], 0  ;;  %s412_s0 = inlined_call_operand.hbm [shape: f32[8,16], index: 0, kind: input, shape index: {}]   ;;  %s413_s1 = inlined_call_operand.hbm [shape: f32[16,32], index: 1, kind: input, shape index: {}]   ;;  %s414_s2 = inlined_call_operand.vmem [shape: f32[1,32], index: 2, kind: input, shape index: {}]   ;;  %s415_s3 = inlined_call_operand.vmem [shape: f32[1,32], index: 3, kind: input, shape index: {}]   ;;  %s416_s4 = inlined_call_operand.<no memory space> [shape: f32[1,1], index: 4, kind: input, shape index: {}]   ;;  %s417_s5 = inlined_call_operand.hbm [shape: f32[1,8], index: 5, kind: output, shape index: {}]  }
   0x1   :  { %12 = vsyncpa [#allocation8], 0 }
   0x2   :  { %13 = vsyncpa [#allocation6], 0  ;;  %s319_s18 = smov [#allocation4]   ;;  %s320_s20 = smov [#allocation7]  }
   0x3   :  { %s20_s19 = sshll.u32 %s319_s18, 4  ;;  %s29_s21 = sshll.u32 %s320_s20, 4  ;;  %s21_s19 = int_to_ptr.vmem [resolvable:$true] %s20_s19  ;;  %s357_s21 = int_to_ptr.vmem [resolvable:$true] %s29_s21 }
   0x4   :  { %s247_s24 = scalar_lea.hbm %s412_s0, 128 }
   0x5   :  { %p248_p0 = scmp.ne.s32.totalorder %s412_s0, %s247_s24  ;;  %p251_p1 = scmp.lt.u32.totalorder %s247_s24, %s412_s0 }
   0x7   :  { %p253_p2 = pnand %p251_p1, %p248_p0 }
   0x9   :  { %256 = shalt.err (!%p253_p2)
}
   0xa   :  { %s257_s29 = scalar_lea.vmem %s21_s19, 128  ;;  %p262_p4 = scmp.lt.s32.totalorder %s21_s19, %s21_s19 }
   0xb   :  { %p258_p3 = scmp.ne.s32.totalorder %s21_s19, %s257_s29  ;;  %p263_p5 = scmp.lt.s32.totalorder %s257_s29, %s257_s29 }
   0xd   :  { %p264_p6 = por %p263_p5, %p262_p4 }
   0xf   :  { %p265_p7 = pnand %p264_p6, %p258_p3 }
  0x11   :  { %268 = shalt.err (!%p265_p7)
}
  0x12   :  { %23 = dma.hbm_to_vmem [thread:$0]  %s412_s0, 128, %s21_s19, [#allocation5]  }
  0x13   :  { %s269_s9 = scalar_lea.hbm %s413_s1, 256 }
  0x14   :  { %p270_p8 = scmp.ne.s32.totalorder %s413_s1, %s269_s9  ;;  %p273_p9 = scmp.lt.u32.totalorder %s269_s9, %s413_s1 }
  0x16   :  { %p275_p10 = pnand %p273_p9, %p270_p8 }
  0x18   :  { %278 = shalt.err (!%p275_p10)
}
  0x19   :  { %s279_s14 = scalar_lea.vmem %s357_s21, 256  ;;  %p284_p12 = scmp.lt.s32.totalorder %s357_s21, %s357_s21 }
  0x1a   :  { %p280_p11 = scmp.ne.s32.totalorder %s357_s21, %s279_s14  ;;  %p285_p13 = scmp.lt.s32.totalorder %s279_s14, %s279_s14 }
  0x1c   :  { %p286_p0 = por %p285_p13, %p284_p12 }
  0x1e   :  { %p287_p1 = pnand %p286_p0, %p280_p11 }
  0x20   :  { %290 = shalt.err (!%p287_p1)
}
  0x21   :  { %s321_s0 = smov 128   ;;  %s322_s15 = smov 8  }
  0x22   :  { %35 = dma.hbm_to_vmem [thread:$0]  %s413_s1, 256, %s357_s21, [#allocation8], %s321_s0, %s321_s0, %s322_s15  }
  0x23   :  { %313 = dma.done.wait [#allocation5], 128  }
  0x24   :  { %314 = vsyncadd [#allocation5], 4294967168 }
  0x25   :  { %315 = dma.done.wait [#allocation8], 256  }
  0x26   :  { %316 = vsyncadd [#allocation8], 4294967040  ;;  %v323_v0 = vmov 0.0|0.0   ;;  %vm324_vm0 = vmmov 0   ;;  %v325_v1 = vmov 0.0   ;;  %vm52_vm1 = vcmask 261120  }
  0x27   :  { %232 = vmatprep.subr.bf16.mxu0 %v323_v0  ;;  %229 = vmatprep.mubr.msk.f32.mxu0 %vm324_vm0, %v325_v1  ;;  %53 = vst.msk [vmem:[#allocation2] sm:$0xff] %vm52_vm1, %v325_v1  ;;  %v56_v2 = vld [vmem:[#allocation7] sm:$0xff]  ;;  %v57_v3 = vld [vmem:[#allocation7 + $0x8] sm:$0xff]  ;;  %v55_v5 = vld [vmem:[#allocation4] sm:$0xff]  ;;  %vm58_vm2 = vcmask 130048   ;;  %v192_v18 = vstv %s416_s4  ;;  %vm200_vm3 = vcmask 57344  }
  0x28   :  { %v233_v4 = vpack.c.bf16 %v57_v3, %v56_v2  ;;  %v219_v10 = vld [vmem:[%s414_s2] ss:$0 sm:$0xff]  ;;  %s326_s2 = smov [#allocation9]  }
  0x29   :  { %v220_v13 = vld [vmem:[%s415_s3] ss:$0 sm:$0xff]  ;;  %s208_s3 = sshll.u32 %s326_s2, 4  ;;  %s209_s3 = int_to_ptr.vmem [resolvable:$true] %s208_s3 }
  0x2a   :  { %234 = vmatpush3.bf16.msra.mxu0 %v233_v4  ;;  %s291_s23 = scalar_lea.vmem %s209_s3, 16  ;;  %s295_s24 = scalar_lea.vmem %s209_s3, 32 }
  0x2b   :  { %p292_p2 = scmp.ne.s32.totalorder %s209_s3, %s291_s23  ;;  %p296_p3 = scmp.lt.s32.totalorder %s209_s3, %s209_s3 }
  0x2c   :  { %p297_p4 = scmp.lt.s32.totalorder %s295_s24, %s291_s23 }
  0x2d   :  { %230 = vmatmul.mubr.msk.f32.vlgmr.msra.gmra.mrb[0].mxu0 %vm58_vm2, %v55_v5 }
  0x2e   :  { %v54_v6 = vld [vmem:[#allocation2] sm:$0xff]  ;;  %p298_p5 = por %p297_p4, %p296_p3 }
  0x30   :  { %p299_p6 = pnand %p298_p5, %p292_p2 }
 0x100   :  { %v128_v7 = vpop.f32.mrb[0].mxu0 }
 0x101   :  { %v132_v8 = vadd.f32 %v128_v7, %v54_v6  ;;  %v231_v9 = vpop.f32.mrb[1].mxu0 }
 0x103   :  { %134 = vst.msk [vmem:[#allocation2] sm:$0xff] %vm52_vm1, %v132_v8 }
 0x10a   :  { %v138_v11 = vld [vmem:[#allocation2] sm:$0xff] }
 0x10b   :  { %v146_v12 = vadd.f32 %v219_v10, %v138_v11 }
 0x10d   :  { %v147_v14 = vmax.f32 %v146_v12, 0.0 }
 0x10f   :  { %v155_v15 = vmul.f32 %v220_v13, %v147_v14 }
 0x111   :  { %v156_v16 = vsel %vm52_vm1, %v155_v15, 0.0 }
 0x112   :  { %157 = vadd.xlane.f32.xlu0 %v156_v16 }
 0x19f   :  { %v158_v17 = vpop.xlane.xlu0 %157 }
 0x1a0   :  { %159 = vxpose.xlu0.b32.start.end [1/1] (short) (narrow) %v158_v17, 8 }
 0x220   :  { %v175_v19 = vpop.trf.xlu0 }
 0x221   :  { %v193_v20 = vadd.f32 %v192_v18, %v175_v19 }
 0x223   :  { %v221_v21 = vmul.f32 -1.442695, %v193_v20 }
 0x225   :  { %243 = vpow2.f32 %v221_v21 }
 0x22f   :  { %v244_v22 = vpop.eup %243 }
 0x230   :  { %v197_v23 = vadd.f32 1.0, %v244_v22 }
 0x232   :  { %245 = vrcp.f32 %v197_v23 }
 0x23c   :  { %v246_v24 = vpop.eup %245 }
 0x23d   :  { %201 = vst.msk [vmem:[#allocation9] sm:$0x1] %vm200_vm3, %v246_v24 }
 0x23e   :  { %302 = shalt.err (!%p299_p6)
}
 0x23f   :  { %s303_s26 = scalar_lea.hbm %s417_s5, 16 }
 0x240   :  { %p304_p7 = scmp.ne.s32.totalorder %s417_s5, %s303_s26  ;;  %p307_p8 = scmp.lt.u32.totalorder %s303_s26, %s417_s5 }
 0x242   :  { %p309_p9 = pnand %p307_p8, %p304_p7 }
 0x244   :  { %312 = shalt.err (!%p309_p9)
}
 0x245   :  { %211 = dma.vmem_to_hbm [thread:$0]  %s209_s3, 16, %s417_s5, [#allocation6]  }
 0x246   :  { %317 = dma.done.wait [#allocation6], 16  }
 0x247   :  { %318 = vsyncadd [#allocation6], 4294967280 }
 0x248   :  { %215 = vsyncpa [#allocation5], 1 }
 0x249   :  { %216 = vsyncpa [#allocation8], 1 }
 0x24a   :  { %217 = vsyncpa [#allocation6], 1 }

</bundles_post_ra>
